<compile_context>
chip_gen: v5e
topology: v5e:2x2
jax: 0.10.0
libtpu: 0.0.40
codegen_flags: <defaults>
</compile_context>

<pallas_src>
import jax
import jax.numpy as jnp
from jax.experimental import pallas as pl
from jax.experimental.pallas import tpu as pltpu

LANES = 512       # lane-dense output width (multiple of 128)
ROW_TILE = 2048   # up to 4 MiB f32 per block


def _reflect_exp_int_kernel(x_ref, o_ref):
    x = x_ref[...].astype(jnp.float32)
    # exp(-x) for x>0 and exp(x) for x<=0 are both exp(-|x|): one EUP op/elem.
    e = jnp.exp(-jnp.abs(x))
    # x>0 branch adds the polynomial x**3/3 + 2*x on top of (exp(-x) - 1).
    poly = x * (x * x * (1.0 / 3.0) + 2.0)
    y = e - 1.0 + jnp.where(x > 0.0, poly, 0.0)
    o_ref[...] = y.astype(o_ref.dtype)  # single lane-dense full-width store


def _reflect_exp_int_2d(x2d, *, tn, lanes):
    rows = x2d.shape[0]
    return pl.pallas_call(
        _reflect_exp_int_kernel,
        out_shape=jax.ShapeDtypeStruct(x2d.shape, x2d.dtype),
        grid=(pl.cdiv(rows, tn),),
        in_specs=[pl.BlockSpec((tn, lanes), lambda i: (i, 0))],
        out_specs=pl.BlockSpec((tn, lanes), lambda i: (i, 0)),
        compiler_params=pltpu.CompilerParams(
            dimension_semantics=("parallel",),        # rows independent -> megacore-shardable
            vmem_limit_bytes=48 * 1024 * 1024,        # covers 4-buffer 4 MiB-block pipeline everywhere
        ),
    )(x2d)


def _reflect_exp_int_jnp(x):
    # Tiny-tail fallback (< LANES elements): same math, plain jnp.
    xf = x.astype(jnp.float32)
    e = jnp.exp(-jnp.abs(xf))
    poly = xf * (xf * xf * (1.0 / 3.0) + 2.0)
    return (e - 1.0 + jnp.where(xf > 0.0, poly, 0.0)).astype(x.dtype)


def reflect_exp_int(x, *, lanes=LANES, row_tile=ROW_TILE):
    """Elementwise ReflectExpInt on an arbitrary-shaped array (Pallas TPU)."""
    orig_shape = x.shape
    n = x.size
    if n == 0:
        return x

    flat = x.reshape(-1)
    n_main = (n // lanes) * lanes

    if n_main == 0:
        # Input smaller than one lane row: not worth a pallas_call.
        return _reflect_exp_int_jnp(flat).reshape(orig_shape)

    rows = n_main // lanes
    if rows <= 8:
        tn = rows  # single full-extent block (legal: block dim == array dim)
    else:
        # >= 2 blocks so v7x can shard across its 2 TCs; rows per block a
        # multiple of 8, capped at row_tile (4 MiB f32 per block).
        half = -(-rows // 2)                       # ceil(rows / 2)
        tn = min(row_tile, -(-half // 8) * 8)      # round up to multiple of 8

    if n_main == n:
        # Fully lane-aligned: zero extra copies (free reshape in, free reshape out).
        out2d = _reflect_exp_int_2d(flat.reshape(rows, lanes), tn=tn, lanes=lanes)
        return out2d.reshape(orig_shape)

    # Unaligned size: kernel on the aligned prefix, tiny tail in plain jnp,
    # one concatenate to stitch (much cheaper than whole-array pad + slice).
    out_main = _reflect_exp_int_2d(
        flat[:n_main].reshape(rows, lanes), tn=tn, lanes=lanes
    ).reshape(-1)
    out_tail = _reflect_exp_int_jnp(flat[n_main:])
    return jnp.concatenate([out_main, out_tail]).reshape(orig_shape)


def _reference(x):
    # Literal transcription of the PyTorch forward.
    return jnp.where(
        x > 0.0,
        jnp.exp(-x) + x ** 3 / 3.0 + 2.0 * x - 1.0,
        jnp.exp(x) - 1.0,
    )


if __name__ == "__main__":
    # Small shape consistent with the module: batch=2, channels=4, 16x16 spatial.
    B, C, H, W = 2, 4, 16, 16

    key = jax.random.PRNGKey(0)
    x = jax.random.normal(key, (B, C, H, W), dtype=jnp.float32) * 2.0  # exercises both branches

    out = jax.block_until_ready(reflect_exp_int(x))

    ref = _reference(x)
    assert out.shape == x.shape and out.dtype == x.dtype
    assert jnp.allclose(out, ref, atol=1e-4, rtol=1e-4), "mismatch vs reference"

    print("KERNEL_OK")
</pallas_src>

<mosaic_0001>
module attributes {stable_mosaic.version = 11 : i64} {
  func.func @_reflect_exp_int_kernel(%arg0: i32, %arg1: memref<4x512xf32, #tpu.memory_space<vmem>>, %arg2: memref<4x512xf32, #tpu.memory_space<vmem>>) attributes {dimension_semantics = [#tpu.dimension_semantics<parallel>], iteration_bounds = array<i64: 1>, scalar_prefetch = 0 : i64, scratch_operands = 0 : i64, tpu.core_type = #tpu.core_type<tc>, window_params = [{transform_indices = @transform_0, window_bounds = array<i64: 4, 512>}, {transform_indices = @transform_1, window_bounds = array<i64: 4, 512>}]} {
    %c0 = arith.constant 0 : index
    %c0_0 = arith.constant 0 : index
    %0 = vector.load %arg1[%c0, %c0_0] : memref<4x512xf32, #tpu.memory_space<vmem>>, vector<4x512xf32>
    %1 = math.absf %0 : vector<4x512xf32>
    %cst = arith.constant 0.000000e+00 : f32
    %2 = vector.broadcast %cst : f32 to vector<4x512xf32>
    %3 = arith.subf %2, %1 : vector<4x512xf32>
    %4 = math.exp %3 : vector<4x512xf32>
    %5 = arith.mulf %0, %0 : vector<4x512xf32>
    %cst_1 = arith.constant 0.333333343 : f32
    %6 = vector.broadcast %cst_1 : f32 to vector<4x512xf32>
    %7 = arith.mulf %5, %6 : vector<4x512xf32>
    %cst_2 = arith.constant 2.000000e+00 : f32
    %8 = vector.broadcast %cst_2 : f32 to vector<4x512xf32>
    %9 = arith.addf %7, %8 : vector<4x512xf32>
    %10 = arith.mulf %0, %9 : vector<4x512xf32>
    %cst_3 = arith.constant 1.000000e+00 : f32
    %11 = vector.broadcast %cst_3 : f32 to vector<4x512xf32>
    %12 = arith.subf %4, %11 : vector<4x512xf32>
    %cst_4 = arith.constant 0.000000e+00 : f32
    %13 = vector.broadcast %cst_4 : f32 to vector<4x512xf32>
    %14 = arith.cmpf ogt, %0, %13 : vector<4x512xf32>
    %cst_5 = arith.constant 0.000000e+00 : f32
    %15 = vector.broadcast %cst_5 : f32 to vector<4x512xf32>
    %16 = arith.select %14, %10, %15 : vector<4x512xi1>, vector<4x512xf32>
    %17 = arith.addf %12, %16 : vector<4x512xf32>
    %c0_6 = arith.constant 0 : index
    %c0_7 = arith.constant 0 : index
    %18 = vector.load %arg2[%c0_6, %c0_7] : memref<4x512xf32, #tpu.memory_space<vmem>>, vector<4x512xf32>
    tpu.vector_store %arg2[%c0_6, %c0_7], %17 {strides = array<i32>} : memref<4x512xf32, #tpu.memory_space<vmem>>, vector<4x512xf32>,
    return
  }
  func.func @transform_0(%arg0: i32) -> (i32, i32) {
    %c0_i32 = arith.constant 0 : i32
    %c0_i32_0 = arith.constant 0 : i32
    return %arg0, %c0_i32 : i32, i32
  }
  func.func @transform_1(%arg0: i32) -> (i32, i32) {
    %c0_i32 = arith.constant 0 : i32
    %c0_i32_0 = arith.constant 0 : i32
    return %arg0, %c0_i32 : i32, i32
  }
}

</mosaic_0001>

<bundles_post_ra>
// kernel: tpu_custom_call.1
= control target key start
LH: loop header
LB: loop body
LE: loop exit
PB: predicated region body
PF: predicated region fallthrough
CT: control target
= control target key end

     0   :  { %6 = vsyncpa [#allocation3], 0  ;;  %s146_s0 = inlined_call_operand.hbm [shape: f32[4,512], index: 0, kind: input, shape index: {}]   ;;  %s147_s1 = inlined_call_operand.hbm [shape: f32[4,512], index: 1, kind: output, shape index: {}]  }
   0x1   :  { %7 = vsyncpa [#allocation4], 0  ;;  %s13_s8 = sshll.u32 %s146_s0, 4  ;;  %s128_s9 = smov [#allocation2]   ;;  %s14_s8 = int_to_ptr.hbm [resolvable:$true] %s13_s8 }
   0x2   :  { %s15_s10 = sshll.u32 %s128_s9, 4  ;;  %s16_s10 = int_to_ptr.vmem [resolvable:$true] %s15_s10 }
   0x3   :  { %18 = dma.hbm_to_vmem [thread:$0]  %s14_s8, 256, %s16_s10, [#allocation3]  }
   0x4   :  { %124 = dma.done.wait [#allocation3], 256  }
   0x5   :  { %125 = vsyncadd [#allocation3], 4294967040  ;;  %v23_v0 = vld [vmem:[#allocation2] sm:$0xff]  ;;  %v24_v1 = vld [vmem:[#allocation2 + $0x8] sm:$0xff]  ;;  %s129_s0 = smov [#allocation5]   ;;  %s58_s14 = sshll.u32 %s147_s1, 4  ;;  %s59_s14 = int_to_ptr.hbm [resolvable:$true] %s58_s14 }
   0x6   :  { %v25_v2 = vand.u32 2147483647, %v23_v0  ;;  %v33_v3 = vmul.f32 %v23_v0, %v23_v0  ;;  %v26_v4 = vand.u32 2147483647, %v24_v1  ;;  %v34_v5 = vmul.f32 %v24_v1, %v24_v1  ;;  %s56_s11 = sshll.u32 %s129_s0, 4  ;;  %s57_s11 = int_to_ptr.vmem [resolvable:$true] %s56_s11 }
   0x7   :  { %vm43_vm0 = vcmp.gt.f32.partialorder %v23_v0, 0.0  ;;  %vm44_vm1 = vcmp.gt.f32.partialorder %v24_v1, 0.0 }
   0x8   :  { %v27_v6 = vsub.f32 0.0, %v25_v2  ;;  %v35_v7 = vmul.f32 0.33333334, %v33_v3  ;;  %v28_v8 = vsub.f32 0.0, %v26_v4  ;;  %v36_v9 = vmul.f32 0.33333334, %v34_v5 }
   0xa   :  { %v29_v10 = vmul.f32 1.442695, %v27_v6  ;;  %v37_v11 = vadd.f32 2.0, %v35_v7  ;;  %v31_v12 = vmul.f32 1.442695, %v28_v8  ;;  %v38_v13 = vadd.f32 2.0, %v36_v9 }
   0xc   :  { %72 = vpow2.f32 %v29_v10  ;;  %v39_v14 = vmul.f32 %v37_v11, %v23_v0  ;;  %v40_v15 = vmul.f32 %v38_v13, %v24_v1 }
   0xd   :  { %74 = vpow2.f32 %v31_v12 }
   0xe   :  { %v45_v17 = vsel %vm43_vm0, %v39_v14, 0.0  ;;  %v46_v20 = vsel %vm44_vm1, %v40_v15, 0.0 }
  0x12   :  { %v73_v16 = vpop.eup %72 }
  0x13   :  { %v75_v18 = vpop.eup %74  ;;  %v68_v19 = vadd.f32 -1.0, %v73_v16 }
  0x14   :  { %v69_v21 = vadd.f32 -1.0, %v75_v18 }
  0x15   :  { %v47_v22 = vadd.f32 %v68_v19, %v45_v17 }
  0x16   :  { %v48_v23 = vadd.f32 %v69_v21, %v46_v20 }
  0x17   :  { %49 = vst [vmem:[#allocation5] sm:$0xff] %v47_v22 }
  0x18   :  { %50 = vst [vmem:[#allocation5 + $0x8] sm:$0xff] %v48_v23 }
  0x19   :  { %61 = dma.vmem_to_hbm [thread:$0]  %s57_s11, 256, %s59_s14, [#allocation4]  }
  0x1a   :  { %126 = dma.done.wait [#allocation4], 256  }
  0x1b   :  { %127 = vsyncadd [#allocation4], 4294967040 }
  0x1c   :  { %66 = vsyncpa [#allocation3], 1 }
  0x1d   :  { %67 = vsyncpa [#allocation4], 1 }

</bundles_post_ra>
